<compile_context>
chip_gen: v6e
topology: v6e:2x2x1
jax: 0.10.0
libtpu: 0.0.40
codegen_flags: <defaults>
</compile_context>

<pallas_src>
import functools

import jax
import jax.numpy as jnp
from jax.experimental import pallas as pl
from jax.experimental.pallas import tpu as pltpu

# ---- deterministic "module config" (no checkpoint load) --------------------
W_REG = 1.0   # weights["regression"]
W_CLS = 0.5   # weights["classification"]

# Regression task shapes (NCHW like a conv output)
B, C, H, W = 2, 4, 16, 16
# Classification task shapes
CLS_B, CLS_NCLASS = 8, 32

# Dispatch / tiling knobs for the scaled path.
GRIDLESS_MAX_ROWS = 4096      # <= 2 MiB/input f32: stay grid-less
BLOCK_ROWS_CAP = 1024         # 512 KiB/block f32; v7x-safe (2 in x 2 buf = 2 MiB)


# ---------------------------------------------------------------------------
# shared in-kernel pieces
# ---------------------------------------------------------------------------
def _cross_entropy_mean(logits, labels, cls_b, n_class):
    """Mean CE over the batch; logits (B,K) any float dtype, labels (B,1) i32."""
    logits = logits.astype(jnp.float32)
    m = jnp.max(logits, axis=-1, keepdims=True)                       # (B, 1)
    lse = jnp.log(jnp.sum(jnp.exp(logits - m), axis=-1, keepdims=True)) + m
    class_ids = jax.lax.broadcasted_iota(jnp.int32, (cls_b, n_class), 1)
    picked = jnp.sum(jnp.where(class_ids == labels, logits, 0.0),
                     axis=-1, keepdims=True)                          # (B, 1)
    return jnp.sum(lse - picked) * (1.0 / float(cls_b))               # scalar


def _write_out(out_ref, mse, ce, total):
    """Full (8,128) unmasked store; row 0 lanes 0/1/2 = mse / ce / total."""
    lane = jax.lax.broadcasted_iota(jnp.int32, (8, 128), 1)
    row = jax.lax.broadcasted_iota(jnp.int32, (8, 128), 0)
    vals = (jnp.where(lane == 0, mse, 0.0)
            + jnp.where(lane == 1, ce, 0.0)
            + jnp.where(lane == 2, total, 0.0))
    out_ref[...] = jnp.where(row == 0, vals, 0.0)


# ---------------------------------------------------------------------------
# grid-less kernel (small inputs: launch/DMA bound, no grid / scratch)
# ---------------------------------------------------------------------------
def _small_kernel(reg_out_ref, reg_tgt_ref, logits_ref, labels_ref, out_ref, *,
                  reg_numel, cls_b, n_class, w_reg, w_cls):
    # regression: MSELoss (mean over all elements); casts stay in-kernel
    diff = (reg_out_ref[...].astype(jnp.float32)
            - reg_tgt_ref[...].astype(jnp.float32))
    # full reduce; the cross-sublane/lane part lowers to XLU shifts (cheap here)
    mse = jnp.sum(diff * diff) * (1.0 / float(reg_numel))

    # classification: CrossEntropyLoss (mean over batch)
    ce = _cross_entropy_mean(logits_ref[...], labels_ref[...], cls_b, n_class)

    total = w_reg * mse + w_cls * ce
    _write_out(out_ref, mse, ce, total)


# ---------------------------------------------------------------------------
# tiled kernel (scaled regression slab: 1-D row grid + SSE accumulator)
# ---------------------------------------------------------------------------
def _tiled_kernel(reg_out_ref, reg_tgt_ref, logits_ref, labels_ref, out_ref,
                  sse_ref, *, reg_numel, cls_b, n_class, w_reg, w_cls):
    i = pl.program_id(0)

    @pl.when(i == 0)
    def _():
        sse_ref[...] = jnp.zeros_like(sse_ref)

    diff = (reg_out_ref[...].astype(jnp.float32)
            - reg_tgt_ref[...].astype(jnp.float32))
    # per-block partial: reduce rows only (keeps the lane reduce out of the
    # hot loop); accumulate lane-wise partials in f32 VMEM scratch.
    sse_ref[...] += jnp.sum(diff * diff, axis=0, keepdims=True)       # (1, 128)

    @pl.when(i == pl.num_programs(0) - 1)
    def _():
        mse = jnp.sum(sse_ref[...]) * (1.0 / float(reg_numel))
        ce = _cross_entropy_mean(logits_ref[...], labels_ref[...], cls_b, n_class)
        total = w_reg * mse + w_cls * ce
        _write_out(out_ref, mse, ce, total)


# ---------------------------------------------------------------------------
# wrapper
# ---------------------------------------------------------------------------
def multi_task_loss(reg_out_nchw, reg_tgt_nchw, logits, labels, *,
                    w_reg=W_REG, w_cls=W_CLS, block_rows=None):
    """Returns dict mirroring MultiTaskLoss.forward: per-task losses + 'total'.

    block_rows=None -> auto (grid-less for small slabs, 1024-row blocks when
    scaled).  Explicit block_rows (multiple of 8) forces the tiled path.
    """
    reg_numel = reg_out_nchw.size
    assert reg_numel % 128 == 0, "regression numel must be a multiple of 128"
    rows = reg_numel // 128
    cls_b, n_class = logits.shape

    # layout plumbing only (no casts, no one-hot materialization):
    #   NCHW -> lane-dense (rows, 128) slab; labels -> (B, 1) int32 column
    reg_out2 = reg_out_nchw.reshape(rows, 128)
    reg_tgt2 = reg_tgt_nchw.reshape(rows, 128)
    labels2d = labels.astype(jnp.int32).reshape(cls_b, 1)

    itemsize = reg_out_nchw.dtype.itemsize
    cost = pl.CostEstimate(
        flops=3 * reg_numel + 8 * cls_b * n_class,
        transcendentals=cls_b * n_class,
        bytes_accessed=(2 * reg_numel * itemsize
                        + cls_b * n_class * logits.dtype.itemsize
                        + cls_b * 4 + 8 * 128 * 4),
    )
    out_shape = jax.ShapeDtypeStruct((8, 128), jnp.float32)

    use_tiled = (block_rows is not None) or (rows > GRIDLESS_MAX_ROWS)

    if not use_tiled:
        kernel = functools.partial(
            _small_kernel, reg_numel=reg_numel, cls_b=cls_b, n_class=n_class,
            w_reg=w_reg, w_cls=w_cls)
        out = pl.pallas_call(
            kernel,
            out_shape=out_shape,
            in_specs=[
                pl.BlockSpec((rows, 128), lambda: (0, 0)),
                pl.BlockSpec((rows, 128), lambda: (0, 0)),
                pl.BlockSpec((cls_b, n_class), lambda: (0, 0)),
                pl.BlockSpec((cls_b, 1), lambda: (0, 0)),
            ],
            out_specs=pl.BlockSpec((8, 128), lambda: (0, 0)),
            cost_estimate=cost,
        )(reg_out2, reg_tgt2, logits, labels2d)
    else:
        br = block_rows if block_rows is not None else min(BLOCK_ROWS_CAP, rows)
        assert br % 8 == 0, "block_rows must be a multiple of 8"
        padded_rows = -(-rows // br) * br
        if padded_rows != rows:
            pad = padded_rows - rows
            # zero-pad both operands: padded rows contribute 0 to the SSE
            reg_out2 = jnp.pad(reg_out2, ((0, pad), (0, 0)))
            reg_tgt2 = jnp.pad(reg_tgt2, ((0, pad), (0, 0)))
        n_blocks = padded_rows // br

        kernel = functools.partial(
            _tiled_kernel, reg_numel=reg_numel, cls_b=cls_b, n_class=n_class,
            w_reg=w_reg, w_cls=w_cls)
        out = pl.pallas_call(
            kernel,
            out_shape=out_shape,
            grid_spec=pltpu.PrefetchScalarGridSpec(
                num_scalar_prefetch=0,
                grid=(n_blocks,),
                in_specs=[
                    pl.BlockSpec((br, 128), lambda i: (i, 0)),
                    pl.BlockSpec((br, 128), lambda i: (i, 0)),
                    # logits / labels stay resident across the whole row grid
                    pl.BlockSpec((cls_b, n_class), lambda i: (0, 0)),
                    pl.BlockSpec((cls_b, 1), lambda i: (0, 0)),
                ],
                out_specs=pl.BlockSpec((8, 128), lambda i: (0, 0)),
                scratch_shapes=[pltpu.VMEM((1, 128), jnp.float32)],
            ),
            compiler_params=pltpu.CompilerParams(
                dimension_semantics=("arbitrary",)),
            cost_estimate=cost,
        )(reg_out2, reg_tgt2, logits, labels2d)

    return {
        "regression": out[0, 0],
        "classification": out[0, 1],
        "total": out[0, 2],
    }


# ---------------------------------------------------------------------------
# pure-JAX reference (mirrors nn.MSELoss / nn.CrossEntropyLoss defaults)
# ---------------------------------------------------------------------------
def _reference(reg_out, reg_tgt, logits, labels, w_reg=W_REG, w_cls=W_CLS):
    mse = jnp.mean((reg_out.astype(jnp.float32) - reg_tgt.astype(jnp.float32)) ** 2)
    logp = jax.nn.log_softmax(logits.astype(jnp.float32), axis=-1)
    ce = -jnp.mean(jnp.take_along_axis(logp, labels[:, None], axis=-1))
    return {"regression": mse, "classification": ce,
            "total": w_reg * mse + w_cls * ce}


if __name__ == "__main__":
    key = jax.random.PRNGKey(0)
    k1, k2, k3, k4, k5, k6 = jax.random.split(key, 6)

    # --- primary test: small shapes, grid-less path --------------------------
    reg_out = jax.random.normal(k1, (B, C, H, W), dtype=jnp.float32)
    reg_tgt = jax.random.normal(k2, (B, C, H, W), dtype=jnp.float32)
    logits = jax.random.normal(k3, (CLS_B, CLS_NCLASS), dtype=jnp.float32)
    labels = jax.random.randint(k4, (CLS_B,), 0, CLS_NCLASS)

    losses = multi_task_loss(reg_out, reg_tgt, logits, labels)
    jax.block_until_ready(losses)

    ref = _reference(reg_out, reg_tgt, logits, labels)
    for name in ("regression", "classification", "total"):
        assert jnp.allclose(losses[name], ref[name], atol=1e-5, rtol=1e-5), (
            name, losses[name], ref[name])

    # --- secondary test: force the tiled (scaled) path on a modest slab ------
    reg_out_l = jax.random.normal(k5, (4, 8, 32, 32), dtype=jnp.float32)  # 256 rows
    reg_tgt_l = jax.random.normal(k6, (4, 8, 32, 32), dtype=jnp.float32)

    losses_l = multi_task_loss(reg_out_l, reg_tgt_l, logits, labels,
                               block_rows=64)  # 4-step row grid
    jax.block_until_ready(losses_l)

    ref_l = _reference(reg_out_l, reg_tgt_l, logits, labels)
    for name in ("regression", "classification", "total"):
        assert jnp.allclose(losses_l[name], ref_l[name], atol=1e-5, rtol=1e-5), (
            name, losses_l[name], ref_l[name])

    print("KERNEL_OK")
</pallas_src>

<mosaic_0001>
module attributes {stable_mosaic.version = 11 : i64} {
  func.func @_small_kernel(%arg0: memref<16x128xf32, #tpu.memory_space<vmem>>, %arg1: memref<16x128xf32, #tpu.memory_space<vmem>>, %arg2: memref<8x32xf32, #tpu.memory_space<vmem>>, %arg3: memref<8x1xi32, #tpu.memory_space<vmem>>, %arg4: memref<8x128xf32, #tpu.memory_space<vmem>>) attributes {dimension_semantics = [], scalar_prefetch = 0 : i64, scratch_operands = 0 : i64, tpu.core_type = #tpu.core_type<tc>} {
    %c0 = arith.constant 0 : index
    %c0_0 = arith.constant 0 : index
    %0 = vector.load %arg0[%c0, %c0_0] : memref<16x128xf32, #tpu.memory_space<vmem>>, vector<16x128xf32>
    %c0_1 = arith.constant 0 : index
    %c0_2 = arith.constant 0 : index
    %1 = vector.load %arg1[%c0_1, %c0_2] : memref<16x128xf32, #tpu.memory_space<vmem>>, vector<16x128xf32>
    %2 = arith.subf %0, %1 : vector<16x128xf32>
    %3 = arith.mulf %2, %2 : vector<16x128xf32>
    %4 = vector.shape_cast %3 : vector<16x128xf32> to vector<1x16x128xf32>
    %cst = arith.constant dense<0.000000e+00> : vector<1xf32>
    %5 = vector.multi_reduction <add>, %4, %cst [1, 2] : vector<1x16x128xf32> to vector<1xf32>
    %6 = vector.shape_cast %5 : vector<1xf32> to vector<1x1x1xf32>
    %7 = vector.extract %6[0, 0, 0] : f32 from vector<1x1x1xf32>
    %cst_3 = arith.constant 4.8828125E-4 : f32
    %8 = arith.mulf %7, %cst_3 : f32
    %c0_4 = arith.constant 0 : index
    %c0_5 = arith.constant 0 : index
    %9 = vector.load %arg2[%c0_4, %c0_5] : memref<8x32xf32, #tpu.memory_space<vmem>>, vector<8x32xf32>
    %c0_6 = arith.constant 0 : index
    %c0_7 = arith.constant 0 : index
    %10 = vector.load %arg3[%c0_6, %c0_7] : memref<8x1xi32, #tpu.memory_space<vmem>>, vector<8x1xi32>
    %cst_8 = arith.constant dense<0xFF800000> : vector<8xf32>
    %11 = vector.multi_reduction <maximumf>, %9, %cst_8 [1] : vector<8x32xf32> to vector<8xf32>
    %12 = vector.shape_cast %11 : vector<8xf32> to vector<8x1xf32>
    %13 = vector.broadcast %12 : vector<8x1xf32> to vector<8x32xf32>
    %14 = arith.subf %9, %13 : vector<8x32xf32>
    %15 = math.exp %14 : vector<8x32xf32>
    %cst_9 = arith.constant dense<0.000000e+00> : vector<8xf32>
    %16 = vector.multi_reduction <add>, %15, %cst_9 [1] : vector<8x32xf32> to vector<8xf32>
    %17 = vector.shape_cast %16 : vector<8xf32> to vector<8x1xf32>
    %18 = math.log %17 : vector<8x1xf32>
    %19 = arith.addf %18, %12 : vector<8x1xf32>
    %20 = tpu.iota {dimensions = array<i32: 1>} : vector<8x32xi32>
    %21 = vector.broadcast %10 : vector<8x1xi32> to vector<8x32xi32>
    %22 = arith.cmpi eq, %20, %21 : vector<8x32xi32>
    %cst_10 = arith.constant 0.000000e+00 : f32
    %23 = vector.broadcast %cst_10 : f32 to vector<8x32xf32>
    %24 = arith.select %22, %9, %23 : vector<8x32xi1>, vector<8x32xf32>
    %cst_11 = arith.constant dense<0.000000e+00> : vector<8xf32>
    %25 = vector.multi_reduction <add>, %24, %cst_11 [1] : vector<8x32xf32> to vector<8xf32>
    %26 = vector.shape_cast %25 : vector<8xf32> to vector<8x1xf32>
    %27 = arith.subf %19, %26 : vector<8x1xf32>
    %28 = vector.shape_cast %27 : vector<8x1xf32> to vector<1x8x1xf32>
    %cst_12 = arith.constant dense<0.000000e+00> : vector<1xf32>
    %29 = vector.multi_reduction <add>, %28, %cst_12 [1, 2] : vector<1x8x1xf32> to vector<1xf32>
    %30 = vector.shape_cast %29 : vector<1xf32> to vector<1x1x1xf32>
    %31 = vector.extract %30[0, 0, 0] : f32 from vector<1x1x1xf32>
    %cst_13 = arith.constant 1.250000e-01 : f32
    %32 = arith.mulf %31, %cst_13 : f32
    %cst_14 = arith.constant 1.000000e+00 : f32
    %33 = arith.mulf %cst_14, %8 : f32
    %cst_15 = arith.constant 5.000000e-01 : f32
    %34 = arith.mulf %cst_15, %32 : f32
    %35 = arith.addf %33, %34 : f32
    %36 = tpu.iota {dimensions = array<i32: 1>} : vector<8x128xi32>
    %37 = tpu.iota {dimensions = array<i32: 0>} : vector<8x128xi32>
    %c0_i32 = arith.constant 0 : i32
    %38 = vector.broadcast %c0_i32 : i32 to vector<8x128xi32>
    %39 = arith.cmpi eq, %36, %38 : vector<8x128xi32>
    %cst_16 = arith.constant 0.000000e+00 : f32
    %40 = vector.broadcast %8 : f32 to vector<8x128xf32>
    %41 = vector.broadcast %cst_16 : f32 to vector<8x128xf32>
    %42 = arith.select %39, %40, %41 : vector<8x128xi1>, vector<8x128xf32>
    %c1_i32 = arith.constant 1 : i32
    %43 = vector.broadcast %c1_i32 : i32 to vector<8x128xi32>
    %44 = arith.cmpi eq, %36, %43 : vector<8x128xi32>
    %cst_17 = arith.constant 0.000000e+00 : f32
    %45 = vector.broadcast %32 : f32 to vector<8x128xf32>
    %46 = vector.broadcast %cst_17 : f32 to vector<8x128xf32>
    %47 = arith.select %44, %45, %46 : vector<8x128xi1>, vector<8x128xf32>
    %48 = arith.addf %42, %47 : vector<8x128xf32>
    %c2_i32 = arith.constant 2 : i32
    %49 = vector.broadcast %c2_i32 : i32 to vector<8x128xi32>
    %50 = arith.cmpi eq, %36, %49 : vector<8x128xi32>
    %cst_18 = arith.constant 0.000000e+00 : f32
    %51 = vector.broadcast %35 : f32 to vector<8x128xf32>
    %52 = vector.broadcast %cst_18 : f32 to vector<8x128xf32>
    %53 = arith.select %50, %51, %52 : vector<8x128xi1>, vector<8x128xf32>
    %54 = arith.addf %48, %53 : vector<8x128xf32>
    %c0_i32_19 = arith.constant 0 : i32
    %55 = vector.broadcast %c0_i32_19 : i32 to vector<8x128xi32>
    %56 = arith.cmpi eq, %37, %55 : vector<8x128xi32>
    %cst_20 = arith.constant 0.000000e+00 : f32
    %57 = vector.broadcast %cst_20 : f32 to vector<8x128xf32>
    %58 = arith.select %56, %54, %57 : vector<8x128xi1>, vector<8x128xf32>
    %c0_21 = arith.constant 0 : index
    %c0_22 = arith.constant 0 : index
    %59 = vector.load %arg4[%c0_21, %c0_22] : memref<8x128xf32, #tpu.memory_space<vmem>>, vector<8x128xf32>
    tpu.vector_store %arg4[%c0_21, %c0_22], %58 {strides = array<i32>} : memref<8x128xf32, #tpu.memory_space<vmem>>, vector<8x128xf32>,
    return
  }
}

</mosaic_0001>

<bundles_post_ra>
// kernel: tpu_custom_call.1
= control target key start
LH: loop header
LB: loop body
LE: loop exit
PB: predicated region body
PF: predicated region fallthrough
CT: control target
= control target key end

     0   :  { %9 = vsyncpa [#allocation3], 0  ;;  %s273_s0 = inlined_call_operand.hbm [shape: f32[16,128], index: 0, kind: input, shape index: {}]   ;;  %s274_s1 = inlined_call_operand.hbm [shape: f32[16,128], index: 1, kind: input, shape index: {}]   ;;  %s275_s2 = inlined_call_operand.vmem [shape: f32[8,32], index: 2, kind: input, shape index: {}]   ;;  %s276_s3 = inlined_call_operand.vmem [shape: s32[8,1], index: 3, kind: input, shape index: {}]   ;;  %s277_s4 = inlined_call_operand.hbm [shape: f32[8,128], index: 4, kind: output, shape index: {}]  }
   0x1   :  { %10 = vsyncpa [#allocation6], 0 }
   0x2   :  { %11 = vsyncpa [#allocation4], 0  ;;  %s218_s15 = smov [#allocation2]  }
   0x3   :  { %s17_s16 = sshll.u32 %s218_s15, 4  ;;  %s18_s16 = int_to_ptr.vmem [resolvable:$true] %s17_s16 }
   0x4   :  { %s160_s17 = scalar_lea.vmem %s18_s16, 256  ;;  %p165_p1 = scmp.lt.s32.totalorder %s18_s16, %s18_s16 }
   0x5   :  { %p161_p0 = scmp.ne.s32.totalorder %s18_s16, %s160_s17  ;;  %p166_p2 = scmp.lt.s32.totalorder %s160_s17, %s160_s17 }
   0x7   :  { %p167_p3 = por %p166_p2, %p165_p1 }
   0x9   :  { %p168_p4 = pnand %p167_p3, %p161_p0 }
   0xb   :  { %171 = shalt.err (!%p168_p4)
}
   0xc   :  { %s219_s18 = smov 128   ;;  %s220_s19 = smov 8  }
   0xd   :  { %23 = dma.hbm_to_vmem [thread:$0]  %s273_s0, 256, %s18_s16, [#allocation3], %s219_s18, %s219_s18, %s220_s19  }
   0xe   :  { %s221_s22 = smov [#allocation5]  }
   0xf   :  { %s29_s23 = sshll.u32 %s221_s22, 4  ;;  %s30_s23 = int_to_ptr.vmem [resolvable:$true] %s29_s23 }
  0x10   :  { %s180_s24 = scalar_lea.vmem %s30_s23, 256  ;;  %p185_p6 = scmp.lt.s32.totalorder %s30_s23, %s30_s23 }
  0x11   :  { %p181_p5 = scmp.ne.s32.totalorder %s30_s23, %s180_s24  ;;  %p186_p7 = scmp.lt.s32.totalorder %s180_s24, %s180_s24 }
  0x13   :  { %p187_p8 = por %p186_p7, %p185_p6 }
  0x15   :  { %p188_p9 = pnand %p187_p8, %p181_p5 }
  0x17   :  { %191 = shalt.err (!%p188_p9)
}
  0x18   :  { %35 = dma.hbm_to_vmem [thread:$0]  %s274_s1, 256, %s30_s23, [#allocation6], %s219_s18, %s219_s18, %s220_s19  }
  0x19   :  { %212 = dma.done.wait [#allocation3], 256  }
  0x1a   :  { %213 = vsyncadd [#allocation3], 4294967040 }
  0x1b   :  { %214 = dma.done.wait [#allocation6], 256  }
  0x1c   :  { %215 = vsyncadd [#allocation6], 4294967040  ;;  %v222_v0 = vmov 0   ;;  %vm67_vm0 = vcmask 261120   ;;  %v65_v1 = vld [vmem:[%s275_s2] sm:$0xff]  ;;  %v80_v7 = vlaneseq  ;;  %v47_v15 = vld [vmem:[#allocation2 + $0x8] sm:$0xff] }
  0x1d   :  { %147 = vset.pattern.permute.xlu0 %v222_v0  ;;  %v68_v2 = vsel %vm67_vm0, %v65_v1, -inf  ;;  %v66_v3 = vld [vmem:[%s276_s3] sm:$0xff]  ;;  %v48_v16 = vld [vmem:[#allocation5] sm:$0xff]  ;;  %v49_v17 = vld [vmem:[#allocation5 + $0x8] sm:$0xff]  ;;  %vm91_vm2 = vcmask 7168   ;;  %s223_s7 = smov [#allocation7]  }
  0x1e   :  { %69 = vmax.xlane.f32.xlu0 %v68_v2  ;;  %v262_v8 = vand.u32 127, %v80_v7  ;;  %v46_v14 = vld [vmem:[#allocation2] sm:$0xff]  ;;  %v51_v19 = vsub.f32 %v47_v15, %v49_v17  ;;  %v106_v47 = vshrl.u32 %v80_v7, 7  ;;  %s127_s8 = sshll.u32 %s223_s7, 4  ;;  %s128_s8 = int_to_ptr.vmem [resolvable:$true] %s127_s8 }
  0x1f   :  { %v50_v18 = vsub.f32 %v46_v14, %v48_v16  ;;  %s192_s9 = scalar_lea.vmem %s128_s8, 128  ;;  %p197_p11 = scmp.lt.s32.totalorder %s128_s8, %s128_s8 }
  0x20   :  { %v53_v21 = vmul.f32 %v51_v19, %v51_v19  ;;  %vm110_vm3 = vcmp.eq.s32.totalorder %v262_v8, 1  ;;  %vm107_vm4 = vcmp.eq.s32.totalorder %v262_v8, 0  ;;  %vm114_vm5 = vcmp.eq.s32.totalorder %v262_v8, 2  ;;  %p193_p10 = scmp.ne.s32.totalorder %s128_s8, %s192_s9  ;;  %p198_p12 = scmp.lt.s32.totalorder %s192_s9, %s192_s9 }
  0x21   :  { %v52_v20 = vmul.f32 %v50_v18, %v50_v18  ;;  %vm118_vm6 = vcmp.eq.s32.totalorder %v106_v47, 0 }
  0x22   :  { %p199_p13 = por %p198_p12, %p197_p11 }
  0x23   :  { %v54_v22 = vadd.f32 %v53_v21, %v52_v20 }
  0x24   :  { %p200_p0 = pnand %p199_p13, %p193_p10 }
  0x34   :  { %83 = vperm.xlu0 %147, %v66_v3  }
  0xa7   :  { %v70_v4 = vpop.xlane.xlu0 %69 }
  0xa8   :  { %v71_v5 = vsub.f32 %v65_v1, %v70_v4 }
  0xaa   :  { %v72_v6 = vmul.f32 1.442695, %v71_v5 }
  0xac   :  { %148 = vpow2.f32 %v72_v6 }
  0xaf   :  { %v84_v9 = vpop.permute.xlu0 %83 }
  0xb0   :  { %vm85_vm1 = vcmp.eq.s32.totalorder %v262_v8, %v84_v9 }
  0xb1   :  { %v86_v11 = vsel %vm85_vm1, %v65_v1, 0.0 }
  0xb2   :  { %v87_v13 = vsel %vm67_vm0, %v86_v11, 0.0 }
  0xb9   :  { %v149_v10 = vpop.eup %148 }
  0xba   :  { %v74_v12 = vsel %vm67_vm0, %v149_v10, 0.0 }
  0xbb   :  { %75 = vadd.xlane.f32.xlu1 %v74_v12 }
  0xbf   :  { %88 = vadd.xlane.f32.xlu1 %v87_v13 }
  0xc3   :  { %55 = vadd.xlane.f32.xlu1 %v54_v22 }
 0x144   :  { %v76_v23 = vpop.xlane.xlu1 %75 }
 0x145   :  { %150 = vlog2.f32 %v76_v23 }
 0x148   :  { %v89_v26 = vpop.xlane.xlu1 %88 }
 0x14c   :  { %v56_v30 = vpop.xlane.xlu1 %55 }
 0x14d   :  { %v57_v31 = vrot.slane %v56_v30, 4 }
 0x14f   :  { %v58_v32 = vadd.f32 %v57_v31, %v56_v30 }
 0x151   :  { %v59_v33 = vrot.slane %v58_v32, 2 }
 0x152   :  { %v151_v24 = vpop.eup %150 }
 0x153   :  { %v78_v25 = vmul.f32 0.6931472, %v151_v24  ;;  %v60_v34 = vadd.f32 %v59_v33, %v58_v32 }
 0x155   :  { %v79_v27 = vadd.f32 %v78_v25, %v70_v4  ;;  %v61_v35 = vrot.slane %v60_v34, 1 }
 0x157   :  { %v90_v28 = vsub.f32 %v79_v27, %v89_v26  ;;  %v62_v36 = vadd.f32 %v61_v35, %v60_v34 }
 0x159   :  { %v92_v29 = vsel %vm91_vm2, %v90_v28, 0.0  ;;  %137 = vpush %v62_v36 }
 0x15a   :  { %93 = vadd.xlane.f32.xlu1 %v92_v29 }
 0x18a   :  { %s138_s1 = spop %137 }
 0x18b   :  { %s64_s2 = smul.f32 0.00048828125, %s138_s1 }
 0x18d   :  { %v108_v44 = vstv %s64_s2 }
 0x18e   :  { %v109_v48 = vsel %vm107_vm4, %v108_v44, 0.0 }
 0x1e3   :  { %v94_v37 = vpop.xlane.xlu1 %93 }
 0x1e4   :  { %v95_v38 = vrot.slane %v94_v37, 4 }
 0x1e6   :  { %v96_v39 = vadd.f32 %v95_v38, %v94_v37 }
 0x1e8   :  { %v97_v40 = vrot.slane %v96_v39, 2 }
 0x1ea   :  { %v98_v41 = vadd.f32 %v97_v40, %v96_v39 }
 0x1ec   :  { %v99_v42 = vrot.slane %v98_v41, 1 }
 0x1ee   :  { %v100_v43 = vadd.f32 %v99_v42, %v98_v41 }
 0x1f0   :  { %139 = vpush %v100_v43 }
 0x221   :  { %s140_s3 = spop %139 }
 0x222   :  { %s102_s30 = smul.f32 0.125, %s140_s3 }
 0x224   :  { %s103_s5 = smul.f32 0.5, %s102_s30  ;;  %v111_v45 = vstv %s102_s30 }
 0x225   :  { %v112_v46 = vsel %vm110_vm3, %v111_v45, 0.0 }
 0x226   :  { %s104_s6 = sadd.f32 %s103_s5, %s64_s2  ;;  %v113_v49 = vadd.f32 %v112_v46, %v109_v48 }
 0x228   :  { %v115_v50 = vstv %s104_s6 }
 0x229   :  { %v116_v51 = vsel %vm114_vm5, %v115_v50, 0.0 }
 0x22a   :  { %v117_v52 = vadd.f32 %v116_v51, %v113_v49 }
 0x22c   :  { %v119_v53 = vsel %vm118_vm6, %v117_v52, 0.0 }
 0x22d   :  { %120 = vst [vmem:[#allocation7] sm:$0xff] %v119_v53 }
 0x22e   :  { %203 = shalt.err (!%p200_p0)
}
 0x22f   :  { %130 = dma.vmem_to_hbm [thread:$0]  %s128_s8, 128, %s277_s4, [#allocation4]  }
 0x230   :  { %216 = dma.done.wait [#allocation4], 128  }
 0x231   :  { %217 = vsyncadd [#allocation4], 4294967168 }
 0x232   :  { %134 = vsyncpa [#allocation3], 1 }
 0x233   :  { %135 = vsyncpa [#allocation6], 1 }
 0x234   :  { %136 = vsyncpa [#allocation4], 1 }

</bundles_post_ra>
